<compile_context>
chip_gen: v5e
topology: v5e:2x2
jax: 0.10.0
libtpu: 0.0.40
codegen_flags: <defaults>
</compile_context>

<pallas_src>
import math
import functools

import jax
import jax.numpy as jnp
from jax import lax
from jax.experimental import pallas as pl
from jax.experimental.pallas import tpu as pltpu

F32 = jnp.float32
BF16 = jnp.bfloat16
NEG_FILL = -1e30  # finite large-negative mask value (avoids -inf/NaN edge cases)


# ------------------------------------------------------------------
# In-kernel helpers
# ------------------------------------------------------------------

def _layernorm(h, w, b, eps=1e-5):
    h = h.astype(F32)
    mu = jnp.mean(h, axis=-1, keepdims=True)
    var = jnp.mean((h - mu) ** 2, axis=-1, keepdims=True)
    return (h - mu) * lax.rsqrt(var + eps) * w + b


def _new_gelu(h):
    c = math.sqrt(2.0 / math.pi)
    return 0.5 * h * (1.0 + jnp.tanh(c * (h + 0.044715 * h * h * h)))


# ------------------------------------------------------------------
# Pallas kernels
# ------------------------------------------------------------------

def block_kernel(x_ref,
                 ln1w_ref, ln1b_ref, wqkv_ref, bqkv_ref,
                 wproj_ref, bproj_ref,
                 ln2w_ref, ln2b_ref, wfc_ref, bfc_ref, wmp_ref, bmp_ref,
                 o_ref, *, n_head, scale):
    """Entire transformer block for one batch element (all heads in-VMEM)."""
    x = x_ref[0].astype(F32)                                 # (T, C)
    T, C = x.shape
    hd = C // n_head

    # ---- LN1 + fused QKV projection (single MXU matmul, contraction K = C) ----
    h = _layernorm(x, ln1w_ref[...], ln1b_ref[...])
    qkv = jnp.dot(h.astype(BF16), wqkv_ref[...],
                  preferred_element_type=F32) + bqkv_ref[...]          # (T, 3C) f32

    # causal mask shared across heads
    row = lax.broadcasted_iota(jnp.int32, (T, T), 0)
    col = lax.broadcasted_iota(jnp.int32, (T, T), 1)
    causal = col <= row

    wp = wproj_ref[...]                                      # (C, C) bf16

    # ---- causal attention, all heads this grid step; per-head output is
    #      accumulated through its W_proj slice into a lane-dense (T, C) acc ----
    attn_proj = jnp.zeros((T, C), F32)
    for hix in range(n_head):
        lo = hix * hd
        qh = (qkv[:, lo:lo + hd] * scale).astype(BF16)       # scale folded into q
        kh = qkv[:, C + lo:C + lo + hd].astype(BF16)
        vh = qkv[:, 2 * C + lo:2 * C + lo + hd].astype(BF16)

        # q @ k^T without an explicit transpose (contract last dims)
        att = lax.dot_general(qh, kh, (((1,), (1,)), ((), ())),
                              preferred_element_type=F32)    # (T, T) f32
        att = jnp.where(causal, att, NEG_FILL)
        att = att - jnp.max(att, axis=-1, keepdims=True)
        p = jnp.exp(att)
        p = p * pl.reciprocal(jnp.sum(p, axis=-1, keepdims=True), approx=True)

        yh = jnp.dot(p.astype(BF16), vh, preferred_element_type=F32)   # (T, hd)
        attn_proj = attn_proj + jnp.dot(yh.astype(BF16), wp[lo:lo + hd, :],
                                        preferred_element_type=F32)

    x = x + attn_proj + bproj_ref[...]                       # residual 1

    # ---- LN2 + MLP (NewGELU) + residual ----
    h = _layernorm(x, ln2w_ref[...], ln2b_ref[...])
    h = jnp.dot(h.astype(BF16), wfc_ref[...], preferred_element_type=F32) + bfc_ref[...]
    h = _new_gelu(h)                                         # f32 stats / tanh on EUP
    h = jnp.dot(h.astype(BF16), wmp_ref[...], preferred_element_type=F32) + bmp_ref[...]

    o_ref[0] = (x + h).astype(o_ref.dtype)                   # bf16 residual stream out


def final_heads_kernel(x_ref, lnw_ref, lnb_ref, hw_ref, hb_ref, o_ref):
    """Final LayerNorm + fused (C, vocab-tile) head matmul, lane-dense store."""
    h = _layernorm(x_ref[0], lnw_ref[...], lnb_ref[...])
    logits = jnp.dot(h.astype(BF16), hw_ref[...],
                     preferred_element_type=F32) + hb_ref[...]
    o_ref[0] = logits.astype(o_ref.dtype)


# ------------------------------------------------------------------
# Pallas wrappers
# ------------------------------------------------------------------

def _spec(block_shape, index_map, single_buffer=False):
    if single_buffer:
        return pl.BlockSpec(block_shape, index_map, pipeline_mode=pl.Buffered(1))
    return pl.BlockSpec(block_shape, index_map)


def _const_spec(arr):
    """Full-array spec, constant block index -> single-buffered (no overlap to gain)."""
    nd = arr.ndim
    return _spec(arr.shape, lambda *_, _nd=nd: (0,) * _nd, single_buffer=True)


def _vmem_limit_bytes(weight_bytes, act_bytes):
    # Budget = resident weights + pipelined activation tiles + headroom, capped at
    # 80% of *this chip's* physical VMEM (v7x: 64 MiB -> ~51 MiB cap; v5e/v6e:
    # 128 MiB -> ~102 MiB cap), floored at 32 MiB.
    try:
        phys = int(pltpu.get_tpu_info().vmem_capacity_bytes)
    except Exception:
        phys = 64 << 20  # conservative (v7x per-TensorCore VMEM)
    cap = int(phys * 0.8)
    est = int(weight_bytes) + 2 * int(act_bytes) + (8 << 20)
    return min(cap, max(32 << 20, est))


def _pick_tile(n, cap, align):
    """Largest tile <= cap that divides n and is a multiple of align (else n)."""
    if n <= cap:
        return n
    t = (cap // align) * align
    while t >= align:
        if n % t == 0:
            return t
        t -= align
    return n


def run_block(x, blk, *, n_head):
    B, T, C = x.shape
    weights = [blk["ln1_w"], blk["ln1_b"], blk["w_qkv"], blk["b_qkv"],
               blk["w_proj"], blk["b_proj"],
               blk["ln2_w"], blk["ln2_b"],
               blk["w_fc"], blk["b_fc"], blk["w_mp"], blk["b_mp"]]
    in_specs = ([_spec((1, T, C), lambda b: (b, 0, 0))] +
                [_const_spec(w) for w in weights])
    out_specs = _spec((1, T, C), lambda b: (b, 0, 0))

    w_bytes = sum(int(w.size) * w.dtype.itemsize for w in weights)
    # x (bf16 in + f32 working copy), qkv, per-head scores, (T,4C) MLP intermediate
    act_bytes = T * C * (2 + 4 + 4) + T * 3 * C * 4 + T * T * 4 + T * 4 * C * 4
    scale = 1.0 / math.sqrt(C // n_head)

    return pl.pallas_call(
        functools.partial(block_kernel, n_head=n_head, scale=scale),
        out_shape=jax.ShapeDtypeStruct((B, T, C), BF16),
        grid_spec=pltpu.PrefetchScalarGridSpec(
            num_scalar_prefetch=0, grid=(B,),
            in_specs=in_specs, out_specs=out_specs),
        compiler_params=pltpu.CompilerParams(
            dimension_semantics=("parallel",),
            vmem_limit_bytes=_vmem_limit_bytes(w_bytes, act_bytes)),
        input_output_aliases={0: 0},   # residual stream updated in place
    )(x, *weights)


def run_final_heads(x, lnf_w, lnf_b, head_w, head_b):
    B, T, C = x.shape
    KV = head_w.shape[1]
    tm = _pick_tile(T, 512, 8)         # T tiling for real sequence lengths
    tn = _pick_tile(KV, 4096, 128)     # vocab tiling keeps (C,KV) weight VMEM-safe
    nt, nn = T // tm, KV // tn
    const_w = (nn == 1)                # head weight index constant -> single-buffer

    in_specs = [
        _spec((1, tm, C), lambda b, t, n: (b, t, 0)),
        _const_spec(lnf_w),
        _const_spec(lnf_b),
        _spec((C, tn), lambda b, t, n: (0, n), single_buffer=const_w),
        _spec((1, tn), lambda b, t, n: (0, n), single_buffer=const_w),
    ]
    out_specs = _spec((1, tm, tn), lambda b, t, n: (b, t, n))

    w_bytes = ((lnf_w.size + lnf_b.size) * 4 +
               (1 if const_w else 2) * (C * tn * 2 + tn * 4))
    act_bytes = tm * C * (2 + 4) + tm * tn * 4

    return pl.pallas_call(
        final_heads_kernel,
        out_shape=jax.ShapeDtypeStruct((B, T, KV), F32),
        grid_spec=pltpu.PrefetchScalarGridSpec(
            num_scalar_prefetch=0, grid=(B, nt, nn),
            in_specs=in_specs, out_specs=out_specs),
        compiler_params=pltpu.CompilerParams(
            dimension_semantics=("parallel", "parallel", "parallel"),
            vmem_limit_bytes=_vmem_limit_bytes(w_bytes, act_bytes)),
    )(x, lnf_w, lnf_b, head_w, head_b)


# ------------------------------------------------------------------
# Parameter init (deterministic; mimics PyTorch _init_weights shapes)
# ------------------------------------------------------------------

def init_params(key, *, vocab_size, block_size, n_embd, n_head, n_layer, num_codebooks):
    C = n_embd
    keys = iter(jax.random.split(key, 16 + 8 * n_layer + 4 * num_codebooks))

    def lin(fan_in, fan_out, std=0.02):
        # stored as (in, out) bf16 so kernels do x @ W + b (equiv to PyTorch x @ W.T + b)
        return (jax.random.normal(next(keys), (fan_in, fan_out), F32) * std).astype(BF16)

    params = {}
    params["tok_emb"] = jnp.stack(
        [jax.random.normal(next(keys), (vocab_size, C), F32) * 0.02
         for _ in range(num_codebooks)], axis=0)                       # (K, V, C) f32
    params["pos_emb"] = jax.random.normal(next(keys), (block_size, C), F32) * 0.02

    proj_std = 0.02 / math.sqrt(2 * n_layer)
    blocks = []
    for _ in range(n_layer):
        blocks.append(dict(
            ln1_w=jnp.ones((1, C), F32), ln1_b=jnp.zeros((1, C), F32),
            w_qkv=lin(C, 3 * C), b_qkv=jnp.zeros((1, 3 * C), F32),
            w_proj=lin(C, C, std=proj_std), b_proj=jnp.zeros((1, C), F32),
            ln2_w=jnp.ones((1, C), F32), ln2_b=jnp.zeros((1, C), F32),
            w_fc=lin(C, 4 * C), b_fc=jnp.zeros((1, 4 * C), F32),
            w_mp=lin(4 * C, C, std=proj_std), b_mp=jnp.zeros((1, C), F32)))
    params["blocks"] = blocks

    params["lnf_w"] = jnp.ones((1, C), F32)
    params["lnf_b"] = jnp.zeros((1, C), F32)
    # Fuse the K per-codebook head weights into one lane-dense (C, K*V) matmul.
    heads = [jax.random.normal(next(keys), (C, vocab_size), F32) * 0.02
             for _ in range(num_codebooks)]
    params["head_w_fused"] = jnp.concatenate(heads, axis=1).astype(BF16)      # (C, K*V)
    params["head_b_fused"] = jnp.zeros((1, num_codebooks * vocab_size), F32)  # (1, K*V)
    return params


# ------------------------------------------------------------------
# Forward
# ------------------------------------------------------------------

def rapgpt_forward(codes, params, *, n_head):
    """codes: (B, T, K) int32.  Returns logits (B, K, T, vocab)."""
    # torch.squeeze(dim=1) is a no-op for 3-D input; permute(0, 2, 1) -> (B, K, T)
    codes_bkt = jnp.transpose(codes, (0, 2, 1))
    B, K, T = codes_bkt.shape
    C = params["pos_emb"].shape[-1]

    # identity pattern: sequence_codes == codes (TODO(synk) at top of file)
    # token embedding sum over codebooks + positional embeddings (XLA glue gathers)
    tok = jnp.zeros((B, T, C), F32)
    for kk in range(K):
        tok = tok + jnp.take(params["tok_emb"][kk], codes_bkt[:, kk, :], axis=0)
    x = (tok + params["pos_emb"][:T][None, :, :]).astype(BF16)   # dropout (eval) = identity

    for blk in params["blocks"]:
        x = run_block(x, blk, n_head=n_head)        # one fused pallas_call per layer

    logits_flat = run_final_heads(x, params["lnf_w"], params["lnf_b"],
                                  params["head_w_fused"], params["head_b_fused"])  # (B,T,K*V)
    V = logits_flat.shape[-1] // K
    logits = logits_flat.reshape(B, T, K, V).transpose(0, 2, 1, 3)    # (B, K, T, V)
    # torch: permute(0,3,1,2) -> revert_pattern_logits (identity) -> permute(0,2,3,1)
    # net effect with identity pattern: logits stay (B, K, T, V)
    return logits


# ------------------------------------------------------------------
# Main
# ------------------------------------------------------------------

if __name__ == "__main__":
    vocab_size = 64
    block_size = 16
    n_embd = 32
    n_head = 4
    n_layer = 2
    num_codebooks = 2
    B, T = 2, 8

    key = jax.random.PRNGKey(0)
    pkey, dkey = jax.random.split(key)
    params = init_params(pkey, vocab_size=vocab_size, block_size=block_size,
                         n_embd=n_embd, n_head=n_head, n_layer=n_layer,
                         num_codebooks=num_codebooks)

    codes = jax.random.randint(dkey, (B, T, num_codebooks), 0, vocab_size, dtype=jnp.int32)

    forward = jax.jit(functools.partial(rapgpt_forward, n_head=n_head))
    logits = forward(codes, params)
    logits = jax.block_until_ready(logits)

    assert logits.shape == (B, num_codebooks, T, vocab_size), logits.shape
    assert bool(jnp.all(jnp.isfinite(logits)))
    print("KERNEL_OK")
</pallas_src>

<mosaic_0001>
module attributes {stable_mosaic.version = 11 : i64} {
  func.func @final_heads_kernel(%arg0: i32, %arg1: i32, %arg2: i32, %arg3: memref<1x8x32xbf16, #tpu.memory_space<vmem>>, %arg4: memref<1x32xf32, #tpu.memory_space<vmem>>, %arg5: memref<1x32xf32, #tpu.memory_space<vmem>>, %arg6: memref<32x128xbf16, #tpu.memory_space<vmem>>, %arg7: memref<1x128xf32, #tpu.memory_space<vmem>>, %arg8: memref<1x8x128xf32, #tpu.memory_space<vmem>>) attributes {dimension_semantics = [#tpu.dimension_semantics<parallel>, #tpu.dimension_semantics<parallel>, #tpu.dimension_semantics<parallel>], iteration_bounds = array<i64: 2, 1, 1>, scalar_prefetch = 0 : i64, scratch_operands = 0 : i64, tpu.core_type = #tpu.core_type<tc>, window_params = [{transform_indices = @transform_0, window_bounds = array<i64: 1, 8, 32>}, {pipeline_mode = #tpu.pipeline_mode<synchronous>, transform_indices = @transform_1, window_bounds = array<i64: 1, 32>}, {pipeline_mode = #tpu.pipeline_mode<synchronous>, transform_indices = @transform_2, window_bounds = array<i64: 1, 32>}, {pipeline_mode = #tpu.pipeline_mode<synchronous>, transform_indices = @transform_3, window_bounds = array<i64: 32, 128>}, {pipeline_mode = #tpu.pipeline_mode<synchronous>, transform_indices = @transform_4, window_bounds = array<i64: 1, 128>}, {transform_indices = @transform_5, window_bounds = array<i64: 1, 8, 128>}]} {
    %c0 = arith.constant 0 : index
    %c0_0 = arith.constant 0 : index
    %c0_1 = arith.constant 0 : index
    %0 = vector.load %arg3[%c0, %c0_0, %c0_1] : memref<1x8x32xbf16, #tpu.memory_space<vmem>>, vector<1x8x32xbf16>
    %1 = vector.shape_cast %0 : vector<1x8x32xbf16> to vector<8x32xbf16>
    %c0_2 = arith.constant 0 : index
    %c0_3 = arith.constant 0 : index
    %2 = vector.load %arg4[%c0_2, %c0_3] : memref<1x32xf32, #tpu.memory_space<vmem>>, vector<1x32xf32>
    %c0_4 = arith.constant 0 : index
    %c0_5 = arith.constant 0 : index
    %3 = vector.load %arg5[%c0_4, %c0_5] : memref<1x32xf32, #tpu.memory_space<vmem>>, vector<1x32xf32>
    %4 = arith.extf %1 : vector<8x32xbf16> to vector<8x32xf32>
    %cst = arith.constant dense<0.000000e+00> : vector<8xf32>
    %5 = vector.multi_reduction <add>, %4, %cst [1] : vector<8x32xf32> to vector<8xf32>
    %6 = vector.shape_cast %5 : vector<8xf32> to vector<8x1xf32>
    %cst_6 = arith.constant 3.200000e+01 : f32
    %7 = vector.broadcast %cst_6 : f32 to vector<8x1xf32>
    %8 = arith.divf %6, %7 : vector<8x1xf32>
    %9 = vector.broadcast %8 : vector<8x1xf32> to vector<8x32xf32>
    %10 = arith.subf %4, %9 : vector<8x32xf32>
    %11 = arith.mulf %10, %10 : vector<8x32xf32>
    %cst_7 = arith.constant dense<0.000000e+00> : vector<8xf32>
    %12 = vector.multi_reduction <add>, %11, %cst_7 [1] : vector<8x32xf32> to vector<8xf32>
    %13 = vector.shape_cast %12 : vector<8xf32> to vector<8x1xf32>
    %cst_8 = arith.constant 3.200000e+01 : f32
    %14 = vector.broadcast %cst_8 : f32 to vector<8x1xf32>
    %15 = arith.divf %13, %14 : vector<8x1xf32>
    %16 = vector.broadcast %8 : vector<8x1xf32> to vector<8x32xf32>
    %17 = arith.subf %4, %16 : vector<8x32xf32>
    %cst_9 = arith.constant 9.99999974E-6 : f32
    %18 = vector.broadcast %cst_9 : f32 to vector<8x1xf32>
    %19 = arith.addf %15, %18 : vector<8x1xf32>
    %20 = math.rsqrt %19 : vector<8x1xf32>
    %21 = vector.broadcast %20 : vector<8x1xf32> to vector<8x32xf32>
    %22 = arith.mulf %17, %21 : vector<8x32xf32>
    %23 = vector.broadcast %2 : vector<1x32xf32> to vector<8x32xf32>
    %24 = arith.mulf %22, %23 : vector<8x32xf32>
    %25 = vector.broadcast %3 : vector<1x32xf32> to vector<8x32xf32>
    %26 = arith.addf %24, %25 : vector<8x32xf32>
    %27 = arith.truncf %26 : vector<8x32xf32> to vector<8x32xbf16>
    %c0_10 = arith.constant 0 : index
    %c0_11 = arith.constant 0 : index
    %28 = vector.load %arg6[%c0_10, %c0_11] : memref<32x128xbf16, #tpu.memory_space<vmem>>, vector<32x128xbf16>
    %cst_12 = arith.constant dense<0.000000e+00> : vector<8x128xf32>
    %29 = tpu.matmul %27, %28, %cst_12 {dimension_numbers = #tpu.dot_dimension_numbers<[1], [0], [0], [1], [0, 0, 1, 1], [], []>} : vector<8x32xbf16>, vector<32x128xbf16>, vector<8x128xf32> -> vector<8x128xf32>
    %c0_13 = arith.constant 0 : index
    %c0_14 = arith.constant 0 : index
    %30 = vector.load %arg7[%c0_13, %c0_14] : memref<1x128xf32, #tpu.memory_space<vmem>>, vector<1x128xf32>
    %31 = vector.broadcast %30 : vector<1x128xf32> to vector<8x128xf32>
    %32 = arith.addf %29, %31 : vector<8x128xf32>
    %c0_15 = arith.constant 0 : index
    %c0_16 = arith.constant 0 : index
    %c0_17 = arith.constant 0 : index
    %33 = vector.load %arg8[%c0_15, %c0_16, %c0_17] : memref<1x8x128xf32, #tpu.memory_space<vmem>>, vector<1x8x128xf32>
    %34 = vector.shape_cast %33 : vector<1x8x128xf32> to vector<8x128xf32>
    %35 = vector.shape_cast %32 : vector<8x128xf32> to vector<1x8x128xf32>
    tpu.vector_store %arg8[%c0_15, %c0_16, %c0_17], %35 {strides = array<i32>} : memref<1x8x128xf32, #tpu.memory_space<vmem>>, vector<1x8x128xf32>,
    return
  }
  func.func @transform_0(%arg0: i32, %arg1: i32, %arg2: i32) -> (i32, i32, i32) {
    %c0_i32 = arith.constant 0 : i32
    %c0_i32_0 = arith.constant 0 : i32
    return %arg0, %arg1, %c0_i32 : i32, i32, i32
  }
  func.func @transform_1(%arg0: i32, %arg1: i32, %arg2: i32) -> (i32, i32) {
    %c0_i32 = arith.constant 0 : i32
    %c0_i32_0 = arith.constant 0 : i32
    %c0_i32_1 = arith.constant 0 : i32
    return %c0_i32, %c0_i32_0 : i32, i32
  }
  func.func @transform_2(%arg0: i32, %arg1: i32, %arg2: i32) -> (i32, i32) {
    %c0_i32 = arith.constant 0 : i32
    %c0_i32_0 = arith.constant 0 : i32
    %c0_i32_1 = arith.constant 0 : i32
    return %c0_i32, %c0_i32_0 : i32, i32
  }
  func.func @transform_3(%arg0: i32, %arg1: i32, %arg2: i32) -> (i32, i32) {
    %c0_i32 = arith.constant 0 : i32
    %c0_i32_0 = arith.constant 0 : i32
    return %c0_i32, %arg2 : i32, i32
  }
  func.func @transform_4(%arg0: i32, %arg1: i32, %arg2: i32) -> (i32, i32) {
    %c0_i32 = arith.constant 0 : i32
    %c0_i32_0 = arith.constant 0 : i32
    return %c0_i32, %arg2 : i32, i32
  }
  func.func @transform_5(%arg0: i32, %arg1: i32, %arg2: i32) -> (i32, i32, i32) {
    %c0_i32 = arith.constant 0 : i32
    return %arg0, %arg1, %arg2 : i32, i32, i32
  }
}

module attributes {stable_mosaic.version = 11 : i64} {
  func.func @block_kernel(%arg0: i32, %arg1: memref<1x8x32xbf16, #tpu.memory_space<vmem>>, %arg2: memref<1x32xf32, #tpu.memory_space<vmem>>, %arg3: memref<1x32xf32, #tpu.memory_space<vmem>>, %arg4: memref<32x96xbf16, #tpu.memory_space<vmem>>, %arg5: memref<1x96xf32, #tpu.memory_space<vmem>>, %arg6: memref<32x32xbf16, #tpu.memory_space<vmem>>, %arg7: memref<1x32xf32, #tpu.memory_space<vmem>>, %arg8: memref<1x32xf32, #tpu.memory_space<vmem>>, %arg9: memref<1x32xf32, #tpu.memory_space<vmem>>, %arg10: memref<32x128xbf16, #tpu.memory_space<vmem>>, %arg11: memref<1x128xf32, #tpu.memory_space<vmem>>, %arg12: memref<128x32xbf16, #tpu.memory_space<vmem>>, %arg13: memref<1x32xf32, #tpu.memory_space<vmem>>, %arg14: memref<1x8x32xbf16, #tpu.memory_space<vmem>>) attributes {dimension_semantics = [#tpu.dimension_semantics<parallel>], iteration_bounds = array<i64: 2>, scalar_prefetch = 0 : i64, scratch_operands = 0 : i64, tpu.core_type = #tpu.core_type<tc>, window_params = [{transform_indices = @transform_0, window_bounds = array<i64: 1, 8, 32>}, {pipeline_mode = #tpu.pipeline_mode<synchronous>, transform_indices = @transform_1, window_bounds = array<i64: 1, 32>}, {pipeline_mode = #tpu.pipeline_mode<synchronous>, transform_indices = @transform_2, window_bounds = array<i64: 1, 32>}, {pipeline_mode = #tpu.pipeline_mode<synchronous>, transform_indices = @transform_3, window_bounds = array<i64: 32, 96>}, {pipeline_mode = #tpu.pipeline_mode<synchronous>, transform_indices = @transform_4, window_bounds = array<i64: 1, 96>}, {pipeline_mode = #tpu.pipeline_mode<synchronous>, transform_indices = @transform_5, window_bounds = array<i64: 32, 32>}, {pipeline_mode = #tpu.pipeline_mode<synchronous>, transform_indices = @transform_6, window_bounds = array<i64: 1, 32>}, {pipeline_mode = #tpu.pipeline_mode<synchronous>, transform_indices = @transform_7, window_bounds = array<i64: 1, 32>}, {pipeline_mode = #tpu.pipeline_mode<synchronous>, transform_indices = @transform_8, window_bounds = array<i64: 1, 32>}, {pipeline_mode = #tpu.pipeline_mode<synchronous>, transform_indices = @transform_9, window_bounds = array<i64: 32, 128>}, {pipeline_mode = #tpu.pipeline_mode<synchronous>, transform_indices = @transform_10, window_bounds = array<i64: 1, 128>}, {pipeline_mode = #tpu.pipeline_mode<synchronous>, transform_indices = @transform_11, window_bounds = array<i64: 128, 32>}, {pipeline_mode = #tpu.pipeline_mode<synchronous>, transform_indices = @transform_12, window_bounds = array<i64: 1, 32>}, {transform_indices = @transform_13, window_bounds = array<i64: 1, 8, 32>}]} {
    %c0 = arith.constant 0 : index
    %c0_0 = arith.constant 0 : index
    %c0_1 = arith.constant 0 : index
    %0 = vector.load %arg1[%c0, %c0_0, %c0_1] : memref<1x8x32xbf16, #tpu.memory_space<vmem>>, vector<1x8x32xbf16>
    %1 = vector.shape_cast %0 : vector<1x8x32xbf16> to vector<8x32xbf16>
    %2 = arith.extf %1 : vector<8x32xbf16> to vector<8x32xf32>
    %c0_2 = arith.constant 0 : index
    %c0_3 = arith.constant 0 : index
    %3 = vector.load %arg2[%c0_2, %c0_3] : memref<1x32xf32, #tpu.memory_space<vmem>>, vector<1x32xf32>
    %c0_4 = arith.constant 0 : index
    %c0_5 = arith.constant 0 : index
    %4 = vector.load %arg3[%c0_4, %c0_5] : memref<1x32xf32, #tpu.memory_space<vmem>>, vector<1x32xf32>
    %cst = arith.constant dense<0.000000e+00> : vector<8xf32>
    %5 = vector.multi_reduction <add>, %2, %cst [1] : vector<8x32xf32> to vector<8xf32>
    %6 = vector.shape_cast %5 : vector<8xf32> to vector<8x1xf32>
    %cst_6 = arith.constant 3.200000e+01 : f32
    %7 = vector.broadcast %cst_6 : f32 to vector<8x1xf32>
    %8 = arith.divf %6, %7 : vector<8x1xf32>
    %9 = vector.broadcast %8 : vector<8x1xf32> to vector<8x32xf32>
    %10 = arith.subf %2, %9 : vector<8x32xf32>
    %11 = arith.mulf %10, %10 : vector<8x32xf32>
    %cst_7 = arith.constant dense<0.000000e+00> : vector<8xf32>
    %12 = vector.multi_reduction <add>, %11, %cst_7 [1] : vector<8x32xf32> to vector<8xf32>
    %13 = vector.shape_cast %12 : vector<8xf32> to vector<8x1xf32>
    %cst_8 = arith.constant 3.200000e+01 : f32
    %14 = vector.broadcast %cst_8 : f32 to vector<8x1xf32>
    %15 = arith.divf %13, %14 : vector<8x1xf32>
    %16 = vector.broadcast %8 : vector<8x1xf32> to vector<8x32xf32>
    %17 = arith.subf %2, %16 : vector<8x32xf32>
    %cst_9 = arith.constant 9.99999974E-6 : f32
    %18 = vector.broadcast %cst_9 : f32 to vector<8x1xf32>
    %19 = arith.addf %15, %18 : vector<8x1xf32>
    %20 = math.rsqrt %19 : vector<8x1xf32>
    %21 = vector.broadcast %20 : vector<8x1xf32> to vector<8x32xf32>
    %22 = arith.mulf %17, %21 : vector<8x32xf32>
    %23 = vector.broadcast %3 : vector<1x32xf32> to vector<8x32xf32>
    %24 = arith.mulf %22, %23 : vector<8x32xf32>
    %25 = vector.broadcast %4 : vector<1x32xf32> to vector<8x32xf32>
    %26 = arith.addf %24, %25 : vector<8x32xf32>
    %27 = arith.truncf %26 : vector<8x32xf32> to vector<8x32xbf16>
    %c0_10 = arith.constant 0 : index
    %c0_11 = arith.constant 0 : index
    %28 = vector.load %arg4[%c0_10, %c0_11] : memref<32x96xbf16, #tpu.memory_space<vmem>>, vector<32x96xbf16>
    %cst_12 = arith.constant dense<0.000000e+00> : vector<8x96xf32>
    %29 = tpu.matmul %27, %28, %cst_12 {dimension_numbers = #tpu.dot_dimension_numbers<[1], [0], [0], [1], [0, 0, 1, 1], [], []>} : vector<8x32xbf16>, vector<32x96xbf16>, vector<8x96xf32> -> vector<8x96xf32>
    %c0_13 = arith.constant 0 : index
    %c0_14 = arith.constant 0 : index
    %30 = vector.load %arg5[%c0_13, %c0_14] : memref<1x96xf32, #tpu.memory_space<vmem>>, vector<1x96xf32>
    %31 = vector.broadcast %30 : vector<1x96xf32> to vector<8x96xf32>
    %32 = arith.addf %29, %31 : vector<8x96xf32>
    %33 = tpu.iota {dimensions = array<i32: 0>} : vector<8x8xi32>
    %34 = tpu.iota {dimensions = array<i32: 1>} : vector<8x8xi32>
    %35 = arith.cmpi sle, %34, %33 : vector<8x8xi32>
    %c0_15 = arith.constant 0 : index
    %c0_16 = arith.constant 0 : index
    %36 = vector.load %arg6[%c0_15, %c0_16] : memref<32x32xbf16, #tpu.memory_space<vmem>>, vector<32x32xbf16>
    %cst_17 = arith.constant 0.000000e+00 : f32
    %37 = vector.broadcast %cst_17 : f32 to vector<8x32xf32>
    %38 = vector.extract_strided_slice %32 {offsets = [0, 0], sizes = [8, 8], strides = [1, 1]} : vector<8x96xf32> to vector<8x8xf32>
    %cst_18 = arith.constant 0.353553385 : f32
    %39 = vector.broadcast %cst_18 : f32 to vector<8x8xf32>
    %40 = arith.mulf %38, %39 : vector<8x8xf32>
    %41 = arith.truncf %40 : vector<8x8xf32> to vector<8x8xbf16>
    %42 = vector.extract_strided_slice %32 {offsets = [0, 32], sizes = [8, 8], strides = [1, 1]} : vector<8x96xf32> to vector<8x8xf32>
    %43 = arith.truncf %42 : vector<8x8xf32> to vector<8x8xbf16>
    %44 = vector.extract_strided_slice %32 {offsets = [0, 64], sizes = [8, 8], strides = [1, 1]} : vector<8x96xf32> to vector<8x8xf32>
    %45 = arith.truncf %44 : vector<8x8xf32> to vector<8x8xbf16>
    %cst_19 = arith.constant dense<0.000000e+00> : vector<8x8xf32>
    %46 = tpu.matmul %41, %43, %cst_19 {dimension_numbers = #tpu.dot_dimension_numbers<[1], [1], [0], [0], [0, 0, 1, 0], [], []>} : vector<8x8xbf16>, vector<8x8xbf16>, vector<8x8xf32> -> vector<8x8xf32>
    %cst_20 = arith.constant -1.000000e+30 : f32
    %47 = vector.broadcast %cst_20 : f32 to vector<8x8xf32>
    %48 = arith.select %35, %46, %47 : vector<8x8xi1>, vector<8x8xf32>
    %cst_21 = arith.constant dense<0xFF800000> : vector<8xf32>
    %49 = vector.multi_reduction <maximumf>, %48, %cst_21 [1] : vector<8x8xf32> to vector<8xf32>
    %50 = vector.shape_cast %49 : vector<8xf32> to vector<8x1xf32>
    %51 = vector.broadcast %50 : vector<8x1xf32> to vector<8x8xf32>
    %52 = arith.subf %48, %51 : vector<8x8xf32>
    %53 = math.exp %52 : vector<8x8xf32>
    %cst_22 = arith.constant dense<0.000000e+00> : vector<8xf32>
    %54 = vector.multi_reduction <add>, %53, %cst_22 [1] : vector<8x8xf32> to vector<8xf32>
    %55 = vector.shape_cast %54 : vector<8xf32> to vector<8x1xf32>
    %56 = tpu.reciprocal %55 {approx = true} : vector<8x1xf32> -> vector<8x1xf32>
    %57 = vector.broadcast %56 : vector<8x1xf32> to vector<8x8xf32>
    %58 = arith.mulf %53, %57 : vector<8x8xf32>
    %59 = arith.truncf %58 : vector<8x8xf32> to vector<8x8xbf16>
    %cst_23 = arith.constant dense<0.000000e+00> : vector<8x8xf32>
    %60 = tpu.matmul %59, %45, %cst_23 {dimension_numbers = #tpu.dot_dimension_numbers<[1], [0], [0], [1], [0, 0, 1, 1], [], []>} : vector<8x8xbf16>, vector<8x8xbf16>, vector<8x8xf32> -> vector<8x8xf32>
    %61 = arith.truncf %60 : vector<8x8xf32> to vector<8x8xbf16>
    %62 = vector.extract_strided_slice %36 {offsets = [0, 0], sizes = [8, 32], strides = [1, 1]} : vector<32x32xbf16> to vector<8x32xbf16>
    %cst_24 = arith.constant dense<0.000000e+00> : vector<8x32xf32>
    %63 = tpu.matmul %61, %62, %cst_24 {dimension_numbers = #tpu.dot_dimension_numbers<[1], [0], [0], [1], [0, 0, 1, 1], [], []>} : vector<8x8xbf16>, vector<8x32xbf16>, vector<8x32xf32> -> vector<8x32xf32>
    %64 = arith.addf %37, %63 : vector<8x32xf32>
    %65 = vector.extract_strided_slice %32 {offsets = [0, 8], sizes = [8, 8], strides = [1, 1]} : vector<8x96xf32> to vector<8x8xf32>
    %cst_25 = arith.constant 0.353553385 : f32
    %66 = vector.broadcast %cst_25 : f32 to vector<8x8xf32>
    %67 = arith.mulf %65, %66 : vector<8x8xf32>
    %68 = arith.truncf %67 : vector<8x8xf32> to vector<8x8xbf16>
    %69 = vector.extract_strided_slice %32 {offsets = [0, 40], sizes = [8, 8], strides = [1, 1]} : vector<8x96xf32> to vector<8x8xf32>
    %70 = arith.truncf %69 : vector<8x8xf32> to vector<8x8xbf16>
    %71 = vector.extract_strided_slice %32 {offsets = [0, 72], sizes = [8, 8], strides = [1, 1]} : vector<8x96xf32> to vector<8x8xf32>
    %72 = arith.truncf %71 : vector<8x8xf32> to vector<8x8xbf16>
    %cst_26 = arith.constant dense<0.000000e+00> : vector<8x8xf32>
    %73 = tpu.matmul %68, %70, %cst_26 {dimension_numbers = #tpu.dot_dimension_numbers<[1], [1], [0], [0], [0, 0, 1, 0], [], []>} : vector<8x8xbf16>, vector<8x8xbf16>, vector<8x8xf32> -> vector<8x8xf32>
    %cst_27 = arith.constant -1.000000e+30 : f32
    %74 = vector.broadcast %cst_27 : f32 to vector<8x8xf32>
    %75 = arith.select %35, %73, %74 : vector<8x8xi1>, vector<8x8xf32>
    %cst_28 = arith.constant dense<0xFF800000> : vector<8xf32>
    %76 = vector.multi_reduction <maximumf>, %75, %cst_28 [1] : vector<8x8xf32> to vector<8xf32>
    %77 = vector.shape_cast %76 : vector<8xf32> to vector<8x1xf32>
    %78 = vector.broadcast %77 : vector<8x1xf32> to vector<8x8xf32>
    %79 = arith.subf %75, %78 : vector<8x8xf32>
    %80 = math.exp %79 : vector<8x8xf32>
    %cst_29 = arith.constant dense<0.000000e+00> : vector<8xf32>
    %81 = vector.multi_reduction <add>, %80, %cst_29 [1] : vector<8x8xf32> to vector<8xf32>
    %82 = vector.shape_cast %81 : vector<8xf32> to vector<8x1xf32>
    %83 = tpu.reciprocal %82 {approx = true} : vector<8x1xf32> -> vector<8x1xf32>
    %84 = vector.broadcast %83 : vector<8x1xf32> to vector<8x8xf32>
    %85 = arith.mulf %80, %84 : vector<8x8xf32>
    %86 = arith.truncf %85 : vector<8x8xf32> to vector<8x8xbf16>
    %cst_30 = arith.constant dense<0.000000e+00> : vector<8x8xf32>
    %87 = tpu.matmul %86, %72, %cst_30 {dimension_numbers = #tpu.dot_dimension_numbers<[1], [0], [0], [1], [0, 0, 1, 1], [], []>} : vector<8x8xbf16>, vector<8x8xbf16>, vector<8x8xf32> -> vector<8x8xf32>
    %88 = arith.truncf %87 : vector<8x8xf32> to vector<8x8xbf16>
    %89 = vector.extract_strided_slice %36 {offsets = [8, 0], sizes = [8, 32], strides = [1, 1]} : vector<32x32xbf16> to vector<8x32xbf16>
    %cst_31 = arith.constant dense<0.000000e+00> : vector<8x32xf32>
    %90 = tpu.matmul %88, %89, %cst_31 {dimension_numbers = #tpu.dot_dimension_numbers<[1], [0], [0], [1], [0, 0, 1, 1], [], []>} : vector<8x8xbf16>, vector<8x32xbf16>, vector<8x32xf32> -> vector<8x32xf32>
    %91 = arith.addf %64, %90 : vector<8x32xf32>
    %92 = vector.extract_strided_slice %32 {offsets = [0, 16], sizes = [8, 8], strides = [1, 1]} : vector<8x96xf32> to vector<8x8xf32>
    %cst_32 = arith.constant 0.353553385 : f32
    %93 = vector.broadcast %cst_32 : f32 to vector<8x8xf32>
    %94 = arith.mulf %92, %93 : vector<8x8xf32>
    %95 = arith.truncf %94 : vector<8x8xf32> to vector<8x8xbf16>
    %96 = vector.extract_strided_slice %32 {offsets = [0, 48], sizes = [8, 8], strides = [1, 1]} : vector<8x96xf32> to vector<8x8xf32>
    %97 = arith.truncf %96 : vector<8x8xf32> to vector<8x8xbf16>
    %98 = vector.extract_strided_slice %32 {offsets = [0, 80], sizes = [8, 8], strides = [1, 1]} : vector<8x96xf32> to vector<8x8xf32>
    %99 = arith.truncf %98 : vector<8x8xf32> to vector<8x8xbf16>
    %cst_33 = arith.constant dense<0.000000e+00> : vector<8x8xf32>
    %100 = tpu.matmul %95, %97, %cst_33 {dimension_numbers = #tpu.dot_dimension_numbers<[1], [1], [0], [0], [0, 0, 1, 0], [], []>} : vector<8x8xbf16>, vector<8x8xbf16>, vector<8x8xf32> -> vector<8x8xf32>
    %cst_34 = arith.constant -1.000000e+30 : f32
    %101 = vector.broadcast %cst_34 : f32 to vector<8x8xf32>
    %102 = arith.select %35, %100, %101 : vector<8x8xi1>, vector<8x8xf32>
    %cst_35 = arith.constant dense<0xFF800000> : vector<8xf32>
    %103 = vector.multi_reduction <maximumf>, %102, %cst_35 [1] : vector<8x8xf32> to vector<8xf32>
    %104 = vector.shape_cast %103 : vector<8xf32> to vector<8x1xf32>
    %105 = vector.broadcast %104 : vector<8x1xf32> to vector<8x8xf32>
    %106 = arith.subf %102, %105 : vector<8x8xf32>
    %107 = math.exp %106 : vector<8x8xf32>
    %cst_36 = arith.constant dense<0.000000e+00> : vector<8xf32>
    %108 = vector.multi_reduction <add>, %107, %cst_36 [1] : vector<8x8xf32> to vector<8xf32>
    %109 = vector.shape_cast %108 : vector<8xf32> to vector<8x1xf32>
    %110 = tpu.reciprocal %109 {approx = true} : vector<8x1xf32> -> vector<8x1xf32>
    %111 = vector.broadcast %110 : vector<8x1xf32> to vector<8x8xf32>
    %112 = arith.mulf %107, %111 : vector<8x8xf32>
    %113 = arith.truncf %112 : vector<8x8xf32> to vector<8x8xbf16>
    %cst_37 = arith.constant dense<0.000000e+00> : vector<8x8xf32>
    %114 = tpu.matmul %113, %99, %cst_37 {dimension_numbers = #tpu.dot_dimension_numbers<[1], [0], [0], [1], [0, 0, 1, 1], [], []>} : vector<8x8xbf16>, vector<8x8xbf16>, vector<8x8xf32> -> vector<8x8xf32>
    %115 = arith.truncf %114 : vector<8x8xf32> to vector<8x8xbf16>
    %116 = vector.extract_strided_slice %36 {offsets = [16, 0], sizes = [8, 32], strides = [1, 1]} : vector<32x32xbf16> to vector<8x32xbf16>
    %cst_38 = arith.constant dense<0.000000e+00> : vector<8x32xf32>
    %117 = tpu.matmul %115, %116, %cst_38 {dimension_numbers = #tpu.dot_dimension_numbers<[1], [0], [0], [1], [0, 0, 1, 1], [], []>} : vector<8x8xbf16>, vector<8x32xbf16>, vector<8x32xf32> -> vector<8x32xf32>
    %118 = arith.addf %91, %117 : vector<8x32xf32>
    %119 = vector.extract_strided_slice %32 {offsets = [0, 24], sizes = [8, 8], strides = [1, 1]} : vector<8x96xf32> to vector<8x8xf32>
    %cst_39 = arith.constant 0.353553385 : f32
    %120 = vector.broadcast %cst_39 : f32 to vector<8x8xf32>
    %121 = arith.mulf %119, %120 : vector<8x8xf32>
    %122 = arith.truncf %121 : vector<8x8xf32> to vector<8x8xbf16>
    %123 = vector.extract_strided_slice %32 {offsets = [0, 56], sizes = [8, 8], strides = [1, 1]} : vector<8x96xf32> to vector<8x8xf32>
    %124 = arith.truncf %123 : vector<8x8xf32> to vector<8x8xbf16>
    %125 = vector.extract_strided_slice %32 {offsets = [0, 88], sizes = [8, 8], strides = [1, 1]} : vector<8x96xf32> to vector<8x8xf32>
    %126 = arith.truncf %125 : vector<8x8xf32> to vector<8x8xbf16>
    %cst_40 = arith.constant dense<0.000000e+00> : vector<8x8xf32>
    %127 = tpu.matmul %122, %124, %cst_40 {dimension_numbers = #tpu.dot_dimension_numbers<[1], [1], [0], [0], [0, 0, 1, 0], [], []>} : vector<8x8xbf16>, vector<8x8xbf16>, vector<8x8xf32> -> vector<8x8xf32>
    %cst_41 = arith.constant -1.000000e+30 : f32
    %128 = vector.broadcast %cst_41 : f32 to vector<8x8xf32>
    %129 = arith.select %35, %127, %128 : vector<8x8xi1>, vector<8x8xf32>
    %cst_42 = arith.constant dense<0xFF800000> : vector<8xf32>
    %130 = vector.multi_reduction <maximumf>, %129, %cst_42 [1] : vector<8x8xf32> to vector<8xf32>
    %131 = vector.shape_cast %130 : vector<8xf32> to vector<8x1xf32>
    %132 = vector.broadcast %131 : vector<8x1xf32> to vector<8x8xf32>
    %133 = arith.subf %129, %132 : vector<8x8xf32>
    %134 = math.exp %133 : vector<8x8xf32>
    %cst_43 = arith.constant dense<0.000000e+00> : vector<8xf32>
    %135 = vector.multi_reduction <add>, %134, %cst_43 [1] : vector<8x8xf32> to vector<8xf32>
    %136 = vector.shape_cast %135 : vector<8xf32> to vector<8x1xf32>
    %137 = tpu.reciprocal %136 {approx = true} : vector<8x1xf32> -> vector<8x1xf32>
    %138 = vector.broadcast %137 : vector<8x1xf32> to vector<8x8xf32>
    %139 = arith.mulf %134, %138 : vector<8x8xf32>
    %140 = arith.truncf %139 : vector<8x8xf32> to vector<8x8xbf16>
    %cst_44 = arith.constant dense<0.000000e+00> : vector<8x8xf32>
    %141 = tpu.matmul %140, %126, %cst_44 {dimension_numbers = #tpu.dot_dimension_numbers<[1], [0], [0], [1], [0, 0, 1, 1], [], []>} : vector<8x8xbf16>, vector<8x8xbf16>, vector<8x8xf32> -> vector<8x8xf32>
    %142 = arith.truncf %141 : vector<8x8xf32> to vector<8x8xbf16>
    %143 = vector.extract_strided_slice %36 {offsets = [24, 0], sizes = [8, 32], strides = [1, 1]} : vector<32x32xbf16> to vector<8x32xbf16>
    %cst_45 = arith.constant dense<0.000000e+00> : vector<8x32xf32>
    %144 = tpu.matmul %142, %143, %cst_45 {dimension_numbers = #tpu.dot_dimension_numbers<[1], [0], [0], [1], [0, 0, 1, 1], [], []>} : vector<8x8xbf16>, vector<8x32xbf16>, vector<8x32xf32> -> vector<8x32xf32>
    %145 = arith.addf %118, %144 : vector<8x32xf32>
    %146 = arith.addf %2, %145 : vector<8x32xf32>
    %c0_46 = arith.constant 0 : index
    %c0_47 = arith.constant 0 : index
    %147 = vector.load %arg7[%c0_46, %c0_47] : memref<1x32xf32, #tpu.memory_space<vmem>>, vector<1x32xf32>
    %148 = vector.broadcast %147 : vector<1x32xf32> to vector<8x32xf32>
    %149 = arith.addf %146, %148 : vector<8x32xf32>
    %c0_48 = arith.constant 0 : index
    %c0_49 = arith.constant 0 : index
    %150 = vector.load %arg8[%c0_48, %c0_49] : memref<1x32xf32, #tpu.memory_space<vmem>>, vector<1x32xf32>
    %c0_50 = arith.constant 0 : index
    %c0_51 = arith.constant 0 : index
    %151 = vector.load %arg9[%c0_50, %c0_51] : memref<1x32xf32, #tpu.memory_space<vmem>>, vector<1x32xf32>
    %cst_52 = arith.constant dense<0.000000e+00> : vector<8xf32>
    %152 = vector.multi_reduction <add>, %149, %cst_52 [1] : vector<8x32xf32> to vector<8xf32>
    %153 = vector.shape_cast %152 : vector<8xf32> to vector<8x1xf32>
    %cst_53 = arith.constant 3.200000e+01 : f32
    %154 = vector.broadcast %cst_53 : f32 to vector<8x1xf32>
    %155 = arith.divf %153, %154 : vector<8x1xf32>
    %156 = vector.broadcast %155 : vector<8x1xf32> to vector<8x32xf32>
    %157 = arith.subf %149, %156 : vector<8x32xf32>
    %158 = arith.mulf %157, %157 : vector<8x32xf32>
    %cst_54 = arith.constant dense<0.000000e+00> : vector<8xf32>
    %159 = vector.multi_reduction <add>, %158, %cst_54 [1] : vector<8x32xf32> to vector<8xf32>
    %160 = vector.shape_cast %159 : vector<8xf32> to vector<8x1xf32>
    %cst_55 = arith.constant 3.200000e+01 : f32
    %161 = vector.broadcast %cst_55 : f32 to vector<8x1xf32>
    %162 = arith.divf %160, %161 : vector<8x1xf32>
    %163 = vector.broadcast %155 : vector<8x1xf32> to vector<8x32xf32>
    %164 = arith.subf %149, %163 : vector<8x32xf32>
    %cst_56 = arith.constant 9.99999974E-6 : f32
    %165 = vector.broadcast %cst_56 : f32 to vector<8x1xf32>
    %166 = arith.addf %162, %165 : vector<8x1xf32>
    %167 = math.rsqrt %166 : vector<8x1xf32>
    %168 = vector.broadcast %167 : vector<8x1xf32> to vector<8x32xf32>
    %169 = arith.mulf %164, %168 : vector<8x32xf32>
    %170 = vector.broadcast %150 : vector<1x32xf32> to vector<8x32xf32>
    %171 = arith.mulf %169, %170 : vector<8x32xf32>
    %172 = vector.broadcast %151 : vector<1x32xf32> to vector<8x32xf32>
    %173 = arith.addf %171, %172 : vector<8x32xf32>
    %174 = arith.truncf %173 : vector<8x32xf32> to vector<8x32xbf16>
    %c0_57 = arith.constant 0 : index
    %c0_58 = arith.constant 0 : index
    %175 = vector.load %arg10[%c0_57, %c0_58] : memref<32x128xbf16, #tpu.memory_space<vmem>>, vector<32x128xbf16>
    %cst_59 = arith.constant dense<0.000000e+00> : vector<8x128xf32>
    %176 = tpu.matmul %174, %175, %cst_59 {dimension_numbers = #tpu.dot_dimension_numbers<[1], [0], [0], [1], [0, 0, 1, 1], [], []>} : vector<8x32xbf16>, vector<32x128xbf16>, vector<8x128xf32> -> vector<8x128xf32>
    %c0_60 = arith.constant 0 : index
    %c0_61 = arith.constant 0 : index
    %177 = vector.load %arg11[%c0_60, %c0_61] : memref<1x128xf32, #tpu.memory_space<vmem>>, vector<1x128xf32>
    %178 = vector.broadcast %177 : vector<1x128xf32> to vector<8x128xf32>
    %179 = arith.addf %176, %178 : vector<8x128xf32>
    %cst_62 = arith.constant 5.000000e-01 : f32
    %180 = vector.broadcast %cst_62 : f32 to vector<8x128xf32>
    %181 = arith.mulf %180, %179 : vector<8x128xf32>
    %cst_63 = arith.constant 4.471500e-02 : f32
    %182 = vector.broadcast %cst_63 : f32 to vector<8x128xf32>
    %183 = arith.mulf %182, %179 : vector<8x128xf32>
    %184 = arith.mulf %183, %179 : vector<8x128xf32>
    %185 = arith.mulf %184, %179 : vector<8x128xf32>
    %186 = arith.addf %179, %185 : vector<8x128xf32>
    %cst_64 = arith.constant 0.797884583 : f32
    %187 = vector.broadcast %cst_64 : f32 to vector<8x128xf32>
    %188 = arith.mulf %187, %186 : vector<8x128xf32>
    %189 = math.tanh %188 : vector<8x128xf32>
    %cst_65 = arith.constant 1.000000e+00 : f32
    %190 = vector.broadcast %cst_65 : f32 to vector<8x128xf32>
    %191 = arith.addf %190, %189 : vector<8x128xf32>
    %192 = arith.mulf %181, %191 : vector<8x128xf32>
    %193 = arith.truncf %192 : vector<8x128xf32> to vector<8x128xbf16>
    %c0_66 = arith.constant 0 : index
    %c0_67 = arith.constant 0 : index
    %194 = vector.load %arg12[%c0_66, %c0_67] : memref<128x32xbf16, #tpu.memory_space<vmem>>, vector<128x32xbf16>
    %cst_68 = arith.constant dense<0.000000e+00> : vector<8x32xf32>
    %195 = tpu.matmul %193, %194, %cst_68 {dimension_numbers = #tpu.dot_dimension_numbers<[1], [0], [0], [1], [0, 0, 1, 1], [], []>} : vector<8x128xbf16>, vector<128x32xbf16>, vector<8x32xf32> -> vector<8x32xf32>
    %c0_69 = arith.constant 0 : index
    %c0_70 = arith.constant 0 : index
    %196 = vector.load %arg13[%c0_69, %c0_70] : memref<1x32xf32, #tpu.memory_space<vmem>>, vector<1x32xf32>
    %197 = vector.broadcast %196 : vector<1x32xf32> to vector<8x32xf32>
    %198 = arith.addf %195, %197 : vector<8x32xf32>
    %199 = arith.addf %149, %198 : vector<8x32xf32>
    %200 = arith.truncf %199 : vector<8x32xf32> to vector<8x32xbf16>
    %c0_71 = arith.constant 0 : index
    %c0_72 = arith.constant 0 : index
    %c0_73 = arith.constant 0 : index
    %201 = vector.load %arg14[%c0_71, %c0_72, %c0_73] : memref<1x8x32xbf16, #tpu.memory_space<vmem>>, vector<1x8x32xbf16>
    %202 = vector.shape_cast %201 : vector<1x8x32xbf16> to vector<8x32xbf16>
    %203 = vector.shape_cast %200 : vector<8x32xbf16> to vector<1x8x32xbf16>
    tpu.vector_store %arg14[%c0_71, %c0_72, %c0_73], %203 {strides = array<i32>} : memref<1x8x32xbf16, #tpu.memory_space<vmem>>, vector<1x8x32xbf16>,
    return
  }
  func.func @transform_0(%arg0: i32) -> (i32, i32, i32) {
    %c0_i32 = arith.constant 0 : i32
    %c0_i32_0 = arith.constant 0 : i32
    %c0_i32_1 = arith.constant 0 : i32
    return %arg0, %c0_i32, %c0_i32_0 : i32, i32, i32
  }
  func.func @transform_1(%arg0: i32) -> (i32, i32) {
    %c0_i32 = arith.constant 0 : i32
    %c0_i32_0 = arith.constant 0 : i32
    %c0_i32_1 = arith.constant 0 : i32
    return %c0_i32, %c0_i32_0 : i32, i32
  }
  func.func @transform_2(%arg0: i32) -> (i32, i32) {
    %c0_i32 = arith.constant 0 : i32
    %c0_i32_0 = arith.constant 0 : i32
    %c0_i32_1 = arith.constant 0 : i32
    return %c0_i32, %c0_i32_0 : i32, i32
  }
  func.func @transform_3(%arg0: i32) -> (i32, i32) {
    %c0_i32 = arith.constant 0 : i32
    %c0_i32_0 = arith.constant 0 : i32
    %c0_i32_1 = arith.constant 0 : i32
    return %c0_i32, %c0_i32_0 : i32, i32
  }
  func.func @transform_4(%arg0: i32) -> (i32, i32) {
    %c0_i32 = arith.constant 0 : i32
    %c0_i32_0 = arith.constant 0 : i32
    %c0_i32_1 = arith.constant 0 : i32
    return %c0_i32, %c0_i32_0 : i32, i32
  }
  func.func @transform_5(%arg0: i32) -> (i32, i32) {
    %c0_i32 = arith.constant 0 : i32
    %c0_i32_0 = arith.constant 0 : i32
    %c0_i32_1 = arith.constant 0 : i32
    return %c0_i32, %c0_i32_0 : i32, i32
  }
  func.func @transform_6(%arg0: i32) -> (i32, i32) {
    %c0_i32 = arith.constant 0 : i32
    %c0_i32_0 = arith.constant 0 : i32
    %c0_i32_1 = arith.constant 0 : i32
    return %c0_i32, %c0_i32_0 : i32, i32
  }
  func.func @transform_7(%arg0: i32) -> (i32, i32) {
    %c0_i32 = arith.constant 0 : i32
    %c0_i32_0 = arith.constant 0 : i32
    %c0_i32_1 = arith.constant 0 : i32
    return %c0_i32, %c0_i32_0 : i32, i32
  }
  func.func @transform_8(%arg0: i32) -> (i32, i32) {
    %c0_i32 = arith.constant 0 : i32
    %c0_i32_0 = arith.constant 0 : i32
    %c0_i32_1 = arith.constant 0 : i32
    return %c0_i32, %c0_i32_0 : i32, i32
  }
  func.func @transform_9(%arg0: i32) -> (i32, i32) {
    %c0_i32 = arith.constant 0 : i32
    %c0_i32_0 = arith.constant 0 : i32
    %c0_i32_1 = arith.constant 0 : i32
    return %c0_i32, %c0_i32_0 : i32, i32
  }
  func.func @transform_10(%arg0: i32) -> (i32, i32) {
    %c0_i32 = arith.constant 0 : i32
    %c0_i32_0 = arith.constant 0 : i32
    %c0_i32_1 = arith.constant 0 : i32
    return %c0_i32, %c0_i32_0 : i32, i32
  }
  func.func @transform_11(%arg0: i32) -> (i32, i32) {
    %c0_i32 = arith.constant 0 : i32
    %c0_i32_0 = arith.constant 0 : i32
    %c0_i32_1 = arith.constant 0 : i32
    return %c0_i32, %c0_i32_0 : i32, i32
  }
  func.func @transform_12(%arg0: i32) -> (i32, i32) {
    %c0_i32 = arith.constant 0 : i32
    %c0_i32_0 = arith.constant 0 : i32
    %c0_i32_1 = arith.constant 0 : i32
    return %c0_i32, %c0_i32_0 : i32, i32
  }
  func.func @transform_13(%arg0: i32) -> (i32, i32, i32) {
    %c0_i32 = arith.constant 0 : i32
    %c0_i32_0 = arith.constant 0 : i32
    %c0_i32_1 = arith.constant 0 : i32
    return %arg0, %c0_i32, %c0_i32_0 : i32, i32, i32
  }
}

</mosaic_0001>

<bundles_post_ra>
// kernel: rapgpt_forward.5
= control target key start
LH: loop header
LB: loop body
LE: loop exit
PB: predicated region body
PF: predicated region fallthrough
CT: control target
= control target key end

     0   :  { %s602_s18 = smov 0   ;;  %s604_s19 = smov 0   ;;  %s657_s0 = inlined_call_operand.vmem [shape: bf16[2,8,32], index: 0, kind: input, shape index: {}]   ;;  %s658_s1 = inlined_call_operand.vmem [shape: f32[1,32], index: 1, kind: input, shape index: {}]   ;;  %s659_s2 = inlined_call_operand.vmem [shape: f32[1,32], index: 2, kind: input, shape index: {}]   ;;  %s660_s3 = inlined_call_operand.vmem [shape: bf16[32,128], index: 3, kind: input, shape index: {}]   ;;  %s661_s4 = inlined_call_operand.vmem [shape: f32[1,128], index: 4, kind: input, shape index: {}]   ;;  %s662_s5 = inlined_call_operand.vmem [shape: f32[2,8,128], index: 5, kind: output, shape index: {}]  }
   0x1   :  { %s606_s20 = smov 0  }
   0x2 LB: > { %s34_s21 = sadd.s32 1, %s565_s19  ;;  %p499_p0 = scmp.ge.s32.totalorder %s569_s20, 1  ;;  %s569_s20 = sphi %s606_s20, %s15_s20   ;;  %s565_s19 = sphi %s604_s19, %s664_s19   ;;  %s561_s18 = sphi %s602_s18, %s663_s18  }
   0x3   : > { %p36_p1 = scmp.ge.s32.totalorder %s34_s21, 2  ;;  %p231_p2 = scmp.lt.s32.totalorder %s569_s20, 3 }
   0x5   : > { %s666_s21 = smov (%p36_p1, %s34_s21), 0  ;;  %p232_p3 = pnand %p499_p0, %p231_p2 }
   0x6   : > { %p273_p4 = scmp.lt.s32.totalorder (!%p232_p3), %s561_s18, 1 }
   0x7   : > { %235 = sbr.rel (%p232_p3) target bundleno = 422 (0x1a6), region = 40 }
   0xc   : > { %s668_s18 = smov (!%p273_p4, %s561_s18), 1  ;;  %vm302_vm0 = vcmask 261120   ;;  %v571_v3 = vmov 32.0   ;;  %v514_v15 = vld [vmem:[%s660_s3 + $0x8] sm:$0xff]  ;;  %v513_v16 = vld [vmem:[%s660_s3] sm:$0xff] }
   0xd   : > { %s500_s22 = sshll.u32 %s668_s18, 2  ;;  %543 = vrcp.f32 %v571_v3  ;;  %370 = vmatpush.bf16.msra.mxu0 %v514_v15  ;;  %v540_v26 = vld [vmem:[%s658_s1] ss:$0 sm:$0xff]  ;;  %s501_s9 = sshll.u32 %s668_s18, 3 }
   0xe   : > { %s279_s25 = scalar_lea.vmem %s657_s0, %s500_s22  ;;  %v541_v29 = vld [vmem:[%s659_s2] ss:$0 sm:$0xff]  ;;  %s296_s14 = scalar_lea.vmem %s662_s5, %s501_s9 }
   0xf   : > { %v298_v0 = vld [vmem:[%s279_s25] sm:$0xf] }
  0x10   : > { %v301_v1 = vunpack.c.l.bf16 %v298_v0  ;;  %v542_v33 = vld [vmem:[%s661_s4] ss:$0 sm:$0xff] }
  0x11   : > { %371 = vmatpush.bf16.msra.mxu0 %v513_v16 }
  0x12   : > { %v303_v2 = vsel %vm302_vm0, %v301_v1, 0.0 }
  0x13   : > { %304 = vadd.xlane.f32.xlu0 %v303_v2  ;;  %v544_v4 = vpop.eup %543 }
  0x14   : > { %v307_v5 = vmul.f32 32.0, %v544_v4  ;;  %vm311_vm1 = vweird.f32 %v544_v4 }
  0x16   : > { %v308_v6 = vsub.f32 1.0, %v307_v5 }
  0x18   : > { %v309_v7 = vmul.f32 %v544_v4, %v308_v6 }
  0x1a   : > { %v310_v8 = vadd.f32 %v544_v4, %v309_v7 }
  0x1c   : > { %v312_v9 = vsel %vm311_vm1, %v544_v4, %v310_v8 }
  0x86   : > { %v305_v10 = vpop.xlane.xlu0 %304 }
  0x87   : > { %v313_v11 = vmul.f32 %v312_v9, %v305_v10 }
  0x89   : > { %v314_v12 = vsub.f32 %v301_v1, %v313_v11 }
  0x8b   : > { %v315_v13 = vmul.f32 %v314_v12, %v314_v12 }
  0x8d   : > { %v316_v14 = vsel %vm302_vm0, %v315_v13, 0.0 }
  0x8e   : > { %317 = vadd.xlane.f32.xlu0 %v316_v14 }
 0x101   : > { %v318_v17 = vpop.xlane.xlu0 %317 }
 0x102   : > { %v319_v18 = vmul.f32 %v318_v17, %v312_v9 }
 0x104   : > { %v320_v19 = vadd.f32 1e-05, %v319_v18 }
 0x106   : > { %545 = vrsqrt.f32 %v320_v19  ;;  %vm327_vm3 = vweird.f32 %v320_v19 }
 0x10c   : > { %v546_v20 = vpop.eup %545 }
 0x10d   : > { %v322_v21 = vmul.f32 %v546_v20, %v320_v19  ;;  %vm328_vm2 = vweird.f32 %v546_v20 }
 0x10e   : > { %vm329_vm4 = vmor %vm327_vm3, %vm328_vm2 }
 0x10f   : > { %v323_v22 = vmul.f32 %v546_v20, %v322_v21 }
 0x111   : > { %v324_v23 = vmul.f32 0.5, %v323_v22 }
 0x113   : > { %v325_v24 = vsub.f32 1.5, %v324_v23 }
 0x115   : > { %v326_v25 = vmul.f32 %v546_v20, %v325_v24 }
 0x117   : > { %v330_v27 = vsel %vm329_vm4, %v546_v20, %v326_v25 }
 0x118   : > { %v331_v28 = vmul.f32 %v330_v27, %v314_v12 }
 0x11a   : > { %v335_v30 = vmul.f32 %v540_v26, %v331_v28 }
 0x11c   : > { %v339_v31 = vadd.f32 %v541_v29, %v335_v30 }
 0x11e   : > { %v340_v32 = vpack.c.bf16 %v339_v31, %v339_v31 }
 0x120   : > { %510 = vmatmul.msk.bf16.vlgmr.msra.gmra.mxu0 %vm302_vm0, %v340_v32 }
 0x19d   : > { %v373_v34 = vpop.f32.mrf.mxu0 }
 0x19e   : > { %v374_v35 = vadd.f32 %v542_v33, %v373_v34 }
 0x1a0   : > { %377 = vst [vmem:[%s296_s14] sm:$0xff] %v374_v35 }
 0x1a5   : > { %v375_v36 = vpop.f32.mrf.mxu0 }
 0x1a6 PF: > { %s15_s20 = sadd.s32 1, %s569_s20   ;;  %s663_s18 = smov %s565_s19 }
 0x1a7   : > { %p12_p5 = scmp.ge.s32.totalorder %s15_s20, 4   ;;  %s664_s19 = smov %s666_s21 }
 0x1a9   :  { %14 = sbr.rel (!%p12_p5) target bundleno = 2 (0x2), region = 76 }

// kernel: rapgpt_forward.3
= control target key start
LH: loop header
LB: loop body
LE: loop exit
PB: predicated region body
PF: predicated region fallthrough
CT: control target
= control target key end

     0   :  { %s1288_s25 = smov 0   ;;  %s1469_s0 = inlined_call_operand.vmem [shape: bf16[2,8,32], index: 0, kind: input, shape index: {}, may-alias: {0,13}]   ;;  %s1470_s1 = inlined_call_operand.vmem [shape: f32[1,32], index: 1, kind: input, shape index: {}]   ;;  %s1471_s2 = inlined_call_operand.vmem [shape: f32[1,32], index: 2, kind: input, shape index: {}]   ;;  %s1472_s3 = inlined_call_operand.vmem [shape: bf16[32,96], index: 3, kind: input, shape index: {}]   ;;  %s1473_s4 = inlined_call_operand.vmem [shape: f32[1,96], index: 4, kind: input, shape index: {}]   ;;  %s1474_s5 = inlined_call_operand.vmem [shape: bf16[32,32], index: 5, kind: input, shape index: {}]   ;;  %s1475_s6 = inlined_call_operand.vmem [shape: f32[1,32], index: 6, kind: input, shape index: {}]   ;;  %s1476_s7 = inlined_call_operand.vmem [shape: f32[1,32], index: 7, kind: input, shape index: {}]   ;;  %s1477_s8 = inlined_call_operand.vmem [shape: f32[1,32], index: 8, kind: input, shape index: {}]   ;;  %s1478_s9 = inlined_call_operand.vmem [shape: bf16[32,128], index: 9, kind: input, shape index: {}]   ;;  %s1479_s10 = inlined_call_operand.vmem [shape: f32[1,128], index: 10, kind: input, shape index: {}]   ;;  %s1480_s11 = inlined_call_operand.vmem [shape: bf16[128,32], index: 11, kind: input, shape index: {}]   ;;  %s1481_s12 = inlined_call_operand.vmem [shape: f32[1,32], index: 12, kind: input, shape index: {}]   ;;  %s1482_s13 = inlined_call_operand.vmem [shape: bf16[2,8,32], index: 13, kind: output, shape index: {}, may-alias: {0,13}]  }
   0x1 LB: > { %s1063_s26 = sadd.s32 4294967295, %s1204_s25   ;;  %p1067_p0 = scmp.ge.s32.totalorder %s1204_s25, 1  ;;  %s1204_s25 = sphi %s1288_s25, %s23_s25  }
   0x2   : > { %p386_p1 = scmp.lt.s32.totalorder %s1204_s25, 3 }
   0x4   : > { %p387_p2 = pnand %p1067_p0, %p386_p1 }
   0x5   : > { %p428_p3 = scmp.lt.s32.totalorder (!%p387_p2), %s1063_s26, 1  ;;  %s1207_s24 = smov (!%p387_p2), 88  }
   0x6   : > { %390 = sbr.rel (%p387_p2) target bundleno = 2290 (0x8f2), region = 72  ;;  %s1208_s28 = smov (!%p387_p2), 96  }
   0x7   : > { %s1209_s29 = smov (!%p387_p2), 80   ;;  %s1211_s14 = smov (!%p387_p2), 64  }
   0x8   : > { %s1212_s15 = smov (!%p387_p2), 120   ;;  %s1213_s16 = smov (!%p387_p2), 72  }
   0x9   : > { %s1214_s17 = smov (!%p387_p2), 104   ;;  %s1215_s20 = smov (!%p387_p2), 40  }
   0xa   : > { %s1216_s21 = smov (!%p387_p2), 56   ;;  %s1217_s22 = smov (!%p387_p2), 48  }
   0xb   : > { %s1484_s26 = smov (!%p428_p3, %s1063_s26), 1  ;;  %vm441_vm0 = vcmask 261120   ;;  %v1206_v3 = vmov 32.0   ;;  %v1135_v15 = vld [vmem:[%s1472_s3 + $0x8] sm:$0xff]  ;;  %v1134_v16 = vld [vmem:[%s1472_s3] sm:$0xff]  ;;  %vm531_vm5 = vcmask 64512   ;;  %v516_v46 = vlaneseq }
   0xc   : > { %s1068_s27 = sshll.u32 %s1484_s26, 2  ;;  %1174 = vrcp.f32 %v1206_v3  ;;  %509 = vmatpush.bf16.msra.mxu0 %v1135_v15  ;;  %v1166_v26 = vld [vmem:[%s1470_s1] ss:$0 sm:$0xff]  ;;  %vm569_vm7 = vcmask 1043456   ;;  %vm1008_vm11 = vcmask 257024  }
   0xd   : > { %s431_s30 = scalar_lea.vmem %s1469_s0, %s1068_s27  ;;  %v1167_v29 = vld [vmem:[%s1471_s2] ss:$0 sm:$0xff]  ;;  %v1339_v47 = vshrl.u32 %v516_v46, 7  ;;  %v1341_v48 = vand.u32 127, %v516_v46  ;;  %s435_s19 = scalar_lea.vmem %s1482_s13, %s1068_s27 }
   0xe   : > { %v437_v0 = vld [vmem:[%s431_s30] sm:$0xf]  ;;  %s1210_s30 = smov 112  }
   0xf   : > { %v1304_v1 = vunpack.c.l.bf16 %v437_v0  ;;  %v1168_v33 = vld [vmem:[%s1473_s4] ss:$0 sm:$0xff]  ;;  %vm520_vm6 = vcmp.le.s32.totalorder %v1341_v48, %v1339_v47 }
  0x10   : > { %510 = vmatpush.bf16.msra.mxu0 %v1134_v16  ;;  %v521_v58 = vld [vmem:[%s1474_s5] sm:$0xf] }
  0x11   : > { %v442_v2 = vsel %vm441_vm0, %v1304_v1, 0.0  ;;  %v669_v59 = vsel %vm569_vm7, %v521_v58, 0  ;;  %v523_v58 = vld [vmem:[%s1474_s5 + $0x8] sm:$0xf] }
  0x12   : > { %443 = vadd.xlane.f32.xlu0 %v442_v2  ;;  %v1175_v4 = vpop.eup %1174  ;;  %678 = vmatpush.bf16.msra.mxu1 %v669_v59  ;;  %v746_v59 = vsel %vm569_vm7, %v523_v58, 0 }
  0x13   : > { %v446_v5 = vmul.f32 32.0, %v1175_v4  ;;  %vm450_vm1 = vweird.f32 %v1175_v4 }
  0x15   : > { %v447_v6 = vsub.f32 1.0, %v446_v5 }
  0x17   : > { %v448_v7 = vmul.f32 %v1175_v4, %v447_v6 }
  0x19   : > { %v449_v8 = vadd.f32 %v1175_v4, %v448_v7 }
  0x1b   : > { %v1308_v9 = vsel %vm450_vm1, %v1175_v4, %v449_v8 }
  0x85   : > { %v444_v10 = vpop.xlane.xlu0 %443 }
  0x86   : > { %v452_v11 = vmul.f32 %v1308_v9, %v444_v10 }
  0x88   : > { %v453_v12 = vsub.f32 %v1304_v1, %v452_v11 }
  0x8a   : > { %v454_v13 = vmul.f32 %v453_v12, %v453_v12 }
  0x8c   : > { %v455_v14 = vsel %vm441_vm0, %v454_v13, 0.0 }
  0x8d   : > { %456 = vadd.xlane.f32.xlu0 %v455_v14 }
 0x100   : > { %v457_v17 = vpop.xlane.xlu0 %456 }
 0x101   : > { %v458_v18 = vmul.f32 %v457_v17, %v1308_v9 }
 0x103   : > { %v459_v19 = vadd.f32 1e-05, %v458_v18 }
 0x105   : > { %1176 = vrsqrt.f32 %v459_v19  ;;  %vm466_vm3 = vweird.f32 %v459_v19 }
 0x10b   : > { %v1177_v20 = vpop.eup %1176 }
 0x10c   : > { %v461_v21 = vmul.f32 %v1177_v20, %v459_v19  ;;  %vm467_vm2 = vweird.f32 %v1177_v20 }
 0x10d   : > { %vm468_vm4 = vmor %vm466_vm3, %vm467_vm2 }
 0x10e   : > { %v462_v22 = vmul.f32 %v1177_v20, %v461_v21 }
 0x110   : > { %v463_v23 = vmul.f32 0.5, %v462_v22 }
 0x112   : > { %v464_v24 = vsub.f32 1.5, %v463_v23 }
 0x114   : > { %v465_v25 = vmul.f32 %v1177_v20, %v464_v24 }
 0x116   : > { %v469_v27 = vsel %vm468_vm4, %v1177_v20, %v465_v25 }
 0x117   : > { %v470_v28 = vmul.f32 %v469_v27, %v453_v12 }
 0x119   : > { %v474_v30 = vmul.f32 %v1166_v26, %v470_v28 }
 0x11b   : > { %v478_v31 = vadd.f32 %v1167_v29, %v474_v30 }
 0x11d   : > { %v479_v32 = vpack.c.bf16 %v478_v31, %v478_v31 }
 0x11f   : > { %1078 = vmatmul.msk.bf16.vlgmr.msra.gmra.mxu0 %vm441_vm0, %v479_v32 }
 0x19c   : > { %v512_v34 = vpop.f32.mrf.mxu0 }
 0x19d   : > { %v513_v35 = vadd.f32 %v1168_v33, %v512_v34 }
 0x19f   : > { %v1330_v36 = vpack.c.bf16 %v513_v35, %v513_v35  ;;  %v525_v38 = vmul.f32 0.35355338, %v513_v35 }
 0x1a1   : > { %590 = vrot.lane.b32.xlu0 %v1330_v36, %s1207_s24  ;;  %529 = vrot.lane.b32.xlu1 %v1330_v36, %s1208_s28  ;;  %v526_v39 = vpack.c.bf16 %v525_v38, %v525_v38 }
 0x1a4   : > { %v514_v37 = vpop.f32.mrf.mxu0 }
 0x1a9   : > { %686 = vrot.lane.b32.xlu0 %v1330_v36, %s1209_s29 }
 0x1b1   : > { %684 = vrot.lane.b32.xlu0 %v526_v39, %s1210_s30 }
 0x213   : > { %v591_v40 = vpop.permute.xlu0 %590  ;;  %v530_v41 = vpop.permute.xlu1 %529 }
 0x214   : > { %v536_v42 = vsel %vm531_vm5, %v530_v41, 0  ;;  %v596_v43 = vsel %vm531_vm5, %v591_v40, 0 }
 0x215   : > { %545 = vmatpush.bf16.xpose.msra.mxu3 %v536_v42 }
 0x21b   : > { %v687_v44 = vpop.permute.xlu0 %686 }
 0x21c   : > { %v692_v45 = vsel %vm531_vm5, %v687_v44, 0  ;;  %1079 = vmatmul.msk.bf16.vlgmr.msra.gmra.mxu3 %vm531_vm5, %v526_v39 }
 0x21d   : > { %605 = vmatpush.bf16.xpose.msrb.mxu3 %v596_v43 }
 0x223   : > { %v685_v6 = vpop.permute.xlu0 %684 }
 0x225   : > { %701 = vmatpush.bf16.xpose.msra.mxu3 %v692_v45 }
 0x29f   : > { %v547_v49 = vpop.f32.mrf.mxu3 }
 0x2a0   : > { %v551_v50 = vsel %vm520_vm6, %v547_v49, -1e+30 }
 0x2a1   : > { %v552_v51 = vsel %vm531_vm5, %v551_v50, -inf }
 0x2a2   : > { %553 = vmax.xlane.f32.xlu1 %v552_v51 }
 0x2a7   : > { %v549_v52 = vpop.f32.mrf.mxu3 }
 0x315   : > { %v554_v53 = vpop.xlane.xlu1 %553 }
 0x316   : > { %v555_v54 = vsub.f32 %v551_v50, %v554_v53 }
 0x318   : > { %v556_v55 = vmul.f32 1.442695, %v555_v54 }
 0x31a   : > { %1178 = vpow2.f32 %v556_v55  ;;  %v522_v55 = vld [vmem:[%s1474_s5 + $0x4] sm:$0xf] }
 0x320   : > { %v1179_v56 = vpop.eup %1178 }
 0x321   : > { %v558_v57 = vsel %vm531_vm5, %v1179_v56, 0.0 }
 0x322   : > { %559 = vadd.xlane.f32.xlu2 %v558_v57 }
 0x33a   : > { %564 = vrot.lane.b32.xlu2 %v1330_v36, %s1211_s14 }
 0x342   : > { %588 = vrot.lane.b32.xlu2 %v526_v39, %s1212_s15 }
 0x34a   : > { %764 = vrot.lane.b32.xlu2 %v1330_v36, %s1213_s16 }
 0x352   : > { %762 = vrot.lane.b32.xlu2 %v526_v39, %s1214_s17 }
 0x395   : > { %v560_v60 = vpop.xlane.xlu2 %559 }
 0x396   : > { %1180 = vrcp.f32 %v560_v60 }
 0x39c   : > { %v1181_v61 = vpop.eup %1180 }
 0x39d   : > { %v565_v62 = vpop.permute.xlu2 %564  ;;  %v562_v63 = vmul.f32 %v1181_v61, %v1179_v56  ;;  %v650_v56 = vsel %vm569_vm7, %v522_v55, 0 }
 0x39e   : > { %v571_v0 = vsel %vm569_vm7, %v565_v62, 0  ;;  %659 = vmatpush.bf16.msrb.mxu0 %v650_v56 }
 0x39f   : > { %580 = vmatpush.bf16.msra.mxu2 %v571_v0  ;;  %v563_v2 = vpack.c.bf16 %v562_v63, %v562_v63  ;;  %v524_v63 = vld [vmem:[%s1474_s5 + $0xc] sm:$0xf] }
 0x3a0   : > { %v824_v0 = vsel %vm569_vm7, %v524_v63, 0 }
 0x3a2   : > { %1080 = vmatmul.msk.bf16.vlgmr.msra.gmra.mxu2 %vm531_vm5, %v563_v2  ;;  %755 = vmatpush.bf16.msra.mxu0 %v746_v59 }
 0x3a5   : > { %v589_v3 = vpop.permute.xlu2 %588 }
 0x3a6   : > { %1081 = vmatmul.msk.bf16.vlgmr.msrb.gmra.mxu3 %vm531_vm5, %v589_v3 }
 0x3ad   : > { %v765_v4 = vpop.permute.xlu2 %764 }
 0x3ae   : > { %v770_v5 = vsel %vm531_vm5, %v765_v4, 0 }
 0x3af   : > { %779 = vmatpush.bf16.xpose.msrb.mxu1 %v770_v5 }
 0x3b5   : > { %v763_v15 = vpop.permute.xlu2 %762 }
 0x3b6   : > { %1085 = vmatmul.msk.bf16.vlgmr.msra.gmra.mxu3 %vm531_vm5, %v685_v6 }
 0x425   : > { %v582_v7 = vpop.f32.mrf.mxu2 }
 0x426   : > { %v586_v8 = vpack.c.bf16 %v582_v7, %v582_v7 }
 0x428   : > { %1084 = vmatmul.msk.bf16.vlgmr.msra.gmra.mxu1 %vm531_vm5, %v586_v8 }
 0x429   : > { %v607_v10 = vpop.f32.mrf.mxu3 }
 0x42a   : > { %v611_v11 = vsel %vm520_vm6, %v607_v10, -1e+30 }
 0x42b   : > { %v612_v12 = vsel %vm531_vm5, %v611_v11, -inf }
 0x42c   : > { %613 = vmax.xlane.f32.xlu1 %v612_v12 }
 0x42d   : > { %v584_v13 = vpop.f32.mrf.mxu2 }
 0x431   : > { %v609_v14 = vpop.f32.mrf.mxu3 }
 0x438   : > { %1088 = vmatmul.msk.bf16.vlgmr.msrb.gmra.mxu1 %vm531_vm5, %v763_v15 }
 0x439   : > { %v703_v16 = vpop.f32.mrf.mxu3 }
 0x43a   : > { %v707_v17 = vsel %vm520_vm6, %v703_v16, -1e+30 }
 0x43b   : > { %v708_v18 = vsel %vm531_vm5, %v707_v17, -inf }
 0x43c   : > { %709 = vmax.xlane.f32.xlu2 %v708_v18 }
 0x441   : > { %v705_v19 = vpop.f32.mrf.mxu3 }
 0x454   : > { %798 = vrot.lane.b32.xlu2 %v1330_v36, %s1215_s20 }
 0x49f   : > { %v614_v20 = vpop.xlane.xlu1 %613 }
 0x4a0   : > { %v615_v21 = vsub.f32 %v611_v11, %v614_v20  ;;  %v1169_v20 = vld [vmem:[%s1475_s6] ss:$0 sm:$0xff] }
 0x4a2   : > { %v616_v22 = vmul.f32 1.442695, %v615_v21 }
 0x4a4   : > { %1182 = vpow2.f32 %v616_v22 }
 0x4a5   : > { %v1372_v23 = vpop.f32.mrf.mxu1 }
 0x4aa   : > { %v1183_v24 = vpop.eup %1182 }
 0x4ab   : > { %v618_v25 = vsel %vm531_vm5, %v1183_v24, 0.0 }
 0x4ac   : > { %619 = vadd.xlane.f32.xlu1 %v618_v25 }
 0x4ad   : > { %v682_v26 = vpop.f32.mrf.mxu1 }
 0x4af   : > { %v710_v27 = vpop.xlane.xlu2 %709 }
 0x4b0   : > { %v711_v28 = vsub.f32 %v707_v17, %v710_v27 }
 0x4b2   : > { %v712_v29 = vmul.f32 1.442695, %v711_v28 }
 0x4b4   : > { %1184 = vpow2.f32 %v712_v29 }
 0x4b5   : > { %v781_v30 = vpop.f32.mrf.mxu1 }
 0x4b6   : > { %v785_v31 = vsel %vm520_vm6, %v781_v30, -1e+30  ;;  %v1136_v30 = vld [vmem:[%s1478_s9] sm:$0xff] }
 0x4b7   : > { %v799_v32 = vpop.permute.xlu2 %798  ;;  %v786_v33 = vsel %vm531_vm5, %v785_v31, -inf }
 0x4b8   : > { %v804_v34 = vsel %vm569_vm7, %v799_v32, 0  ;;  %787 = vmax.xlane.f32.xlu0 %v786_v33 }
 0x4b9   : > { %813 = vmatpush.bf16.msrb.mxu3 %v804_v34  ;;  %v1144_v34 = vld [vmem:[%s1480_s11 + $0x30] sm:$0xff] }
 0x4ba   : > { %v1185_v35 = vpop.eup %1184 }
 0x4bb   : > { %v714_v38 = vsel %vm531_vm5, %v1185_v35, 0.0 }
 0x4bd   : > { %v783_v37 = vpop.f32.mrf.mxu1 }
 0x4c0   : > { %715 = vadd.xlane.f32.xlu0 %v714_v38 }
 0x4c5   : > { %624 = vrot.lane.b32.xlu1 %v1330_v36, %s1216_s21 }
 0x4d4   : > { %720 = vrot.lane.b32.xlu0 %v1330_v36, %s1217_s22 }
 0x51f   : > { %v620_v39 = vpop.xlane.xlu1 %619 }
 0x520   : > { %1186 = vrcp.f32 %v620_v39 }
 0x526   : > { %v1187_v43 = vpop.eup %1186 }
 0x527   : > { %v622_v45 = vmul.f32 %v1187_v43, %v1183_v24 }
 0x529   : > { %v623_v50 = vpack.c.bf16 %v622_v45, %v622_v45  ;;  %v1171_v45 = vld [vmem:[%s1477_s8] ss:$0 sm:$0xff] }
 0x52b   : > { %v788_v40 = vpop.xlane.xlu0 %787 }
 0x52c   : > { %v789_v41 = vsub.f32 %v785_v31, %v788_v40  ;;  %v1145_v31 = vld [vmem:[%s1480_s11 + $0x38] sm:$0xff] }
 0x52d   : > { %993 = vmatpush.bf16.msra.mxu1 %v1145_v31 }
 0x52e   : > { %v790_v42 = vmul.f32 1.442695, %v789_v41 }
 0x530   : > { %1188 = vpow2.f32 %v790_v42 }
 0x531   : > { %994 = vmatpush.bf16.msra.mxu1 %v1144_v34 }
 0x533   : > { %v716_v49 = vpop.xlane.xlu0 %715 }
 0x534   : > { %1190 = vrcp.f32 %v716_v49  ;;  %v1143_v49 = vld [vmem:[%s1480_s11 + $0x28] sm:$0xff] }
 0x535   : > { %995 = vmatpush.bf16.msra.mxu1 %v1143_v49 }
 0x536   : > { %v1189_v44 = vpop.eup %1188 }
 0x537   : > { %v625_v46 = vpop.permute.xlu1 %624  ;;  %v792_v47 = vsel %vm531_vm5, %v1189_v44, 0.0 }
 0x538   : > { %793 = vadd.xlane.f32.xlu1 %v792_v47  ;;  %v630_v48 = vsel %vm569_vm7, %v625_v46, 0 }
 0x539   : > { %639 = vmatpush.bf16.msrb.mxu2 %v630_v48 }
 0x53a   : > { %v1191_v36 = vpop.eup %1190 }
 0x53b   : > { %v718_v51 = vmul.f32 %v1191_v36, %v1185_v35  ;;  %v1141_v36 = vld [vmem:[%s1480_s11 + $0x18] sm:$0xff] }
 0x53c   : > { %1082 = vmatmul.msk.bf16.vlgmr.msrb.gmra.mxu2 %vm531_vm5, %v623_v50  ;;  %v1142_v50 = vld [vmem:[%s1480_s11 + $0x20] sm:$0xff] }
 0x53d   : > { %v719_v54 = vpack.c.bf16 %v718_v51, %v718_v51  ;;  %996 = vmatpush.bf16.msra.mxu1 %v1142_v50  ;;  %v1140_v51 = vld [vmem:[%s1480_s11 + $0x10] sm:$0xff] }
 0x541   : > { %997 = vmatpush.bf16.msra.mxu1 %v1141_v36 }
 0x545   : > { %998 = vmatpush.bf16.msra.mxu1 %v1140_v51 }
 0x546   : > { %v721_v52 = vpop.permute.xlu0 %720 }
 0x547   : > { %v726_v53 = vsel %vm569_vm7, %v721_v52, 0  ;;  %v1139_v52 = vld [vmem:[%s1480_s11 + $0x8] sm:$0xff] }
 0x548   : > { %735 = vmatpush.bf16.msra.mxu2 %v726_v53  ;;  %v1138_v53 = vld [vmem:[%s1480_s11] sm:$0xff] }
 0x549   : > { %999 = vmatpush.bf16.msra.mxu1 %v1139_v52 }
 0x54c   : > { %1086 = vmatmul.msk.bf16.vlgmr.msra.gmra.mxu2 %vm531_vm5, %v719_v54  ;;  %v1172_v54 = vld [vmem:[%s1479_s10] ss:$0 sm:$0xff] }
 0x54d   : > { %833 = vmatpush.bf16.msrb.mxu2 %v824_v0  ;;  %1000 = vmatpush.bf16.msra.mxu1 %v1138_v53 }
 0x5ab   : > { %v794_v57 = vpop.xlane.xlu1 %793 }
 0x5ac   : > { %1192 = vrcp.f32 %v794_v57 }
 0x5b2   : > { %v1193_v60 = vpop.eup %1192 }
 0x5b3   : > { %v796_v61 = vmul.f32 %v1193_v60, %v1189_v44 }
 0x5b5   : > { %v797_v62 = vpack.c.bf16 %v796_v61, %v796_v61 }
 0x5b7   : > { %1089 = vmatmul.msk.bf16.vlgmr.msrb.gmra.mxu3 %vm531_vm5, %v797_v62 }
 0x5bf   : > { %v641_v2 = vpop.f32.mrf.mxu2 }
 0x5c0   : > { %v645_v3 = vpack.c.bf16 %v641_v2, %v641_v2 }
 0x5c2   : > { %1083 = vmatmul.msk.bf16.vlgmr.msrb.gmra.mxu0 %vm531_vm5, %v645_v3 }
 0x5c7   : > { %v643_v4 = vpop.f32.mrf.mxu2 }
 0x5cf   : > { %v737_v5 = vpop.f32.mrf.mxu2 }
 0x5d0   : > { %v741_v6 = vpack.c.bf16 %v737_v5, %v737_v5  ;;  %v1173_v5 = vld [vmem:[%s1481_s12] ss:$0 sm:$0xff] }
 0x5d2   : > { %1087 = vmatmul.msk.bf16.vlgmr.msra.gmra.mxu0 %vm531_vm5, %v741_v6 }
 0x5d7   : > { %v739_v7 = vpop.f32.mrf.mxu2 }
 0x63a   : > { %v815_v8 = vpop.f32.mrf.mxu3 }
 0x63b   : > { %v819_v10 = vpack.c.bf16 %v815_v8, %v815_v8 }
 0x63d   : > { %1090 = vmatmul.msk.bf16.vlgmr.msrb.gmra.mxu2 %vm531_vm5, %v819_v10 }
 0x63f   : > { %v661_v11 = vpop.f32.mrf.mxu0 }
 0x640   : > { %v681_v14 = vadd.f32 %v1372_v23, %v661_v11 }
 0x642   : > { %v817_v12 = vpop.f32.mrf.mxu3 }
 0x647   : > { %v663_v13 = vpop.f32.mrf.mxu0 }
 0x64f   : > { %v757_v15 = vpop.f32.mrf.mxu0 }
 0x650   : > { %v761_v16 = vadd.f32 %v757_v15, %v681_v14 }
 0x657   : > { %v759_v17 = vpop.f32.mrf.mxu0 }
 0x6c0   : > { %v835_v18 = vpop.f32.mrf.mxu2 }
 0x6c1   : > { %v839_v19 = vadd.f32 %v835_v18, %v761_v16 }
 0x6c3   : > { %v840_v21 = vadd.f32 %v839_v19, %v1304_v1  ;;  %v1137_v1 = vld [vmem:[%s1478_s9 + $0x8] sm:$0xff] }
 0x6c4   : > { %908 = vmatpush.bf16.msrb.mxu0 %v1137_v1 }
 0x6c5   : > { %v1409_v22 = vadd.f32 %v1169_v20, %v840_v21 }
 0x6c7   : > { %v848_v24 = vsel %vm441_vm0, %v1409_v22, 0.0 }
 0x6c8   : > { %849 = vadd.xlane.f32.xlu2 %v848_v24  ;;  %v837_v25 = vpop.f32.mrf.mxu2  ;;  %909 = vmatpush.bf16.msrb.mxu0 %v1136_v30 }
 0x73b   : > { %v850_v26 = vpop.xlane.xlu2 %849 }
 0x73c   : > { %v851_v23 = vmul.f32 %v850_v26, %v1308_v9 }
 0x73e   : > { %v852_v27 = vsub.f32 %v1409_v22, %v851_v23 }
 0x740   : > { %v853_v28 = vmul.f32 %v852_v27, %v852_v27 }
 0x742   : > { %v854_v29 = vsel %vm441_vm0, %v853_v28, 0.0 }
 0x743   : > { %855 = vadd.xlane.f32.xlu0 %v854_v29 }
 0x7b6   : > { %v856_v32 = vpop.xlane.xlu0 %855 }
 0x7b7   : > { %v857_v33 = vmul.f32 %v856_v32, %v1308_v9  ;;  %v1170_v9 = vld [vmem:[%s1476_s7] ss:$0 sm:$0xff] }
 0x7b9   : > { %v858_v35 = vadd.f32 1e-05, %v857_v33 }
 0x7bb   : > { %1194 = vrsqrt.f32 %v858_v35  ;;  %vm865_vm9 = vweird.f32 %v858_v35 }
 0x7c1   : > { %v1195_v37 = vpop.eup %1194 }
 0x7c2   : > { %v860_v38 = vmul.f32 %v1195_v37, %v858_v35  ;;  %vm866_vm8 = vweird.f32 %v1195_v37 }
 0x7c3   : > { %vm867_vm10 = vmor %vm865_vm9, %vm866_vm8 }
 0x7c4   : > { %v861_v39 = vmul.f32 %v1195_v37, %v860_v38 }
 0x7c6   : > { %v862_v40 = vmul.f32 0.5, %v861_v39 }
 0x7c8   : > { %v863_v41 = vsub.f32 1.5, %v862_v40 }
 0x7ca   : > { %v864_v42 = vmul.f32 %v1195_v37, %v863_v41 }
 0x7cc   : > { %v868_v43 = vsel %vm867_vm10, %v1195_v37, %v864_v42 }
 0x7cd   : > { %v869_v44 = vmul.f32 %v868_v43, %v852_v27 }
 0x7cf   : > { %v873_v46 = vmul.f32 %v1170_v9, %v869_v44 }
 0x7d1   : > { %v877_v47 = vadd.f32 %v1171_v45, %v873_v46 }
 0x7d3   : > { %v878_v48 = vpack.c.bf16 %v877_v47, %v877_v47 }
 0x7d5   : > { %1099 = vmatmul.msk.bf16.vlgmr.msrb.gmra.mxu0 %vm441_vm0, %v878_v48 }
 0x852   : > { %v911_v55 = vpop.f32.mrf.mxu0 }
 0x853   : > { %v912_v56 = vadd.f32 %v1172_v54, %v911_v55 }
 0x855   : > { %v916_v57 = vmul.f32 0.044715, %v912_v56  ;;  %v915_v0 = vmul.f32 0.5, %v912_v56 }
 0x857   : > { %v917_v58 = vmul.f32 %v916_v57, %v912_v56 }
 0x859   : > { %v918_v59 = vmul.f32 %v917_v58, %v912_v56 }
 0x85a   : > { %v913_v60 = vpop.f32.mrf.mxu0 }
 0x85b   : > { %v919_v61 = vadd.f32 %v918_v59, %v912_v56 }
 0x85d   : > { %v920_v62 = vmul.f32 0.7978846, %v919_v61 }
 0x85f   : > { %1196 = vtanh.f32 %v920_v62 }
 0x865   : > { %v1197_v63 = vpop.eup %1196 }
 0x866   : > { %v922_v2 = vadd.f32 1.0, %v1197_v63 }
 0x868   : > { %v923_v3 = vmul.f32 %v922_v2, %v915_v0 }
 0x86a   : > { %v924_v4 = vpack.c.bf16 %v923_v3, %v923_v3 }
 0x86c   : > { %1001 = vmatmul.bf16.vlgmr.msra.gmra.mxu1 %v924_v4 }
 0x8e9   : > { %v1002_v6 = vpop.f32.mrf.mxu1 }
 0x8ea   : > { %v1003_v7 = vadd.f32 %v1173_v5, %v1002_v6 }
 0x8ec   : > { %v1006_v8 = vadd.f32 %v1003_v7, %v1409_v22 }
 0x8ee   : > { %v1007_v10 = vpack.c.bf16 %v1006_v8, %v1006_v8 }
 0x8f0   : > { %1009 = vst.msk [vmem:[%s435_s19] sm:$0xf] %vm1008_vm11, %v1007_v10 }
 0x8f1   : > { %v1004_v11 = vpop.f32.mrf.mxu1 }
 0x8f2 PF: > { %s23_s25 = sadd.s32 1, %s1204_s25  }
 0x8f3   : > { %p20_p4 = scmp.ge.s32.totalorder %s23_s25, 4  }
 0x8f5   :  { %22 = sbr.rel (!%p20_p4) target bundleno = 1 (0x1), region = 102 }

</bundles_post_ra>
